<compile_context>
chip_gen: v6e
topology: v6e:2x2x1
jax: 0.10.0
libtpu: 0.0.40
codegen_flags: <defaults>
</compile_context>

<pallas_src>
import functools
import math

import jax
import jax.numpy as jnp
from jax.experimental import pallas as pl
from jax.experimental.pallas import tpu as pltpu


def _abs_pe_kernel(pos_ref, freq_ref, bias_ref, x_ref, out_ref, *, scale):
    # pos_ref : (TILE_R, 1) f32 -- base sequence position of each packed row
    # freq_ref: (1, L)      f32 -- per-lane angular frequency (even/odd pair shares freq)
    # bias_ref: (1, L)      f32 -- per-lane (within-row seq offset * freq + {0, pi/2})
    # x_ref   : (TILE_R, L) x.dtype -- input slab
    # out_ref : (TILE_R, L) x.dtype
    ang = pos_ref[...] * freq_ref[...] + bias_ref[...]      # (TILE_R, L) f32
    pe = jnp.sin(ang)                                        # cos(x) == sin(x + pi/2)
    if scale != 1.0:
        pe = pe * jnp.float32(scale)
    out_ref[...] = (x_ref[...].astype(jnp.float32) + pe).astype(out_ref.dtype)


def _pick_tile_rows(n_rows: int, row_bytes_in: int, row_bytes_out: int,
                    max_rows: int = 1024) -> int:
    # x and out slabs are each double-buffered by the pipeline:
    #   per-row VMEM cost ~ 2 * (in + out) bytes.  Keep well under scoped VMEM.
    budget = 8 * 1024 * 1024
    per_row = 2 * (row_bytes_in + row_bytes_out)
    cap = max(1, min(max_rows, budget // max(per_row, 1)))
    if n_rows <= cap:
        return n_rows
    for t in range(cap, 0, -1):
        # second-to-last block dim must be a multiple of 8 (or the full extent)
        if n_rows % t == 0 and (t % 8 == 0 or t == n_rows):
            return t
    return n_rows  # fallback: single block (no suitable divisor)


def absolute_positional_encoding(x: jax.Array, *, scale_factor: float = 1.0) -> jax.Array:
    """Forward pass of AbsolutePositionalEncoding (eval mode): x + scale_factor * pe."""
    B, S, D = x.shape
    assert D % 2 == 0, "d_model must be even (matches the PyTorch module)"

    # Pack k consecutive sequence steps per row so the lane dim L = k*D is a
    # multiple of 128 (lane-dense loads/stores). Fall back to k = 1 otherwise.
    k = 128 // math.gcd(D, 128)
    if S % k != 0:
        k = 1
    L = k * D
    n_rows = (B * S) // k
    rows_per_seq = S // k

    # Host-side constants (the PyTorch module builds `pe` once in __init__; here
    # we build factored frequency/bias tables once and fuse the sin into the add).
    d_idx = jnp.arange(D, dtype=jnp.float32)
    freq_d = jnp.exp((2.0 * jnp.floor(d_idx * 0.5)) * (-math.log(10000.0) / D))
    phase_d = jnp.where((jnp.arange(D) % 2) == 1,
                        jnp.float32(math.pi / 2.0), jnp.float32(0.0))
    seq_off = jnp.repeat(jnp.arange(k, dtype=jnp.float32), D)     # (L,)
    freq = jnp.tile(freq_d, k)                                    # (L,)
    bias = seq_off * freq + jnp.tile(phase_d, k)                  # (L,)
    freq = freq.reshape(1, L)
    bias = bias.reshape(1, L)

    r = jnp.arange(n_rows, dtype=jnp.int32)
    pos_base = ((r % rows_per_seq) * k).astype(jnp.float32).reshape(n_rows, 1)

    x2 = x.reshape(n_rows, L)                     # contiguous reshape: no copy
    elem_bytes = jnp.dtype(x.dtype).itemsize

    tile_r = _pick_tile_rows(n_rows, L * elem_bytes, L * elem_bytes)

    out = pl.pallas_call(
        functools.partial(_abs_pe_kernel, scale=float(scale_factor)),
        out_shape=jax.ShapeDtypeStruct((n_rows, L), x.dtype),
        grid_spec=pltpu.PrefetchScalarGridSpec(
            num_scalar_prefetch=0,
            grid=(n_rows // tile_r,),
            in_specs=[
                pl.BlockSpec((tile_r, 1), lambda i: (i, 0)),    # pos_base
                pl.BlockSpec((1, L), lambda i: (0, 0)),         # freq (resident)
                pl.BlockSpec((1, L), lambda i: (0, 0)),         # bias (resident)
                pl.BlockSpec((tile_r, L), lambda i: (i, 0)),    # x slab
            ],
            out_specs=pl.BlockSpec((tile_r, L), lambda i: (i, 0)),
        ),
        compiler_params=pltpu.CompilerParams(
            dimension_semantics=("parallel",),
            vmem_limit_bytes=32 * 1024 * 1024,
        ),
    )(pos_base, freq, bias, x2)

    return out.reshape(B, S, D)


def _reference(x: jax.Array, scale_factor: float = 1.0) -> jax.Array:
    """Pure-JAX mirror of the PyTorch module's forward (eval mode)."""
    _, S, D = x.shape
    position = jnp.arange(S, dtype=jnp.float32)[:, None]
    div_term = jnp.exp(jnp.arange(0, D, 2, dtype=jnp.float32) * (-math.log(10000.0) / D))
    pe = jnp.zeros((S, D), jnp.float32)
    pe = pe.at[:, 0::2].set(jnp.sin(position * div_term))
    pe = pe.at[:, 1::2].set(jnp.cos(position * div_term))
    return x + scale_factor * pe[None]


if __name__ == "__main__":
    B, S, D = 2, 8, 32
    key = jax.random.PRNGKey(0)
    x = jax.random.normal(key, (B, S, D), dtype=jnp.float32)

    out = absolute_positional_encoding(x)
    out = jax.block_until_ready(out)

    ref = _reference(x)
    assert out.shape == (B, S, D)
    assert out.dtype == x.dtype
    assert jnp.allclose(out, ref, atol=1e-5, rtol=1e-5), "mismatch vs reference"

    # Second config exercising a different tiling path (scale + more rows).
    x2 = jax.random.normal(jax.random.PRNGKey(1), (4, 16, 64), dtype=jnp.float32)
    out2 = jax.block_until_ready(absolute_positional_encoding(x2, scale_factor=0.5))
    assert jnp.allclose(out2, _reference(x2, 0.5), atol=1e-5, rtol=1e-5), "mismatch (cfg2)"

    print("KERNEL_OK")
</pallas_src>

<mosaic_0001>
module attributes {stable_mosaic.version = 11 : i64} {
  func.func @_abs_pe_kernel(%arg0: i32, %arg1: memref<4x1xf32, #tpu.memory_space<vmem>>, %arg2: memref<1x128xf32, #tpu.memory_space<vmem>>, %arg3: memref<1x128xf32, #tpu.memory_space<vmem>>, %arg4: memref<4x128xf32, #tpu.memory_space<vmem>>, %arg5: memref<4x128xf32, #tpu.memory_space<vmem>>) attributes {dimension_semantics = [#tpu.dimension_semantics<parallel>], iteration_bounds = array<i64: 1>, scalar_prefetch = 0 : i64, scratch_operands = 0 : i64, tpu.core_type = #tpu.core_type<tc>, window_params = [{transform_indices = @transform_0, window_bounds = array<i64: 4, 1>}, {pipeline_mode = #tpu.pipeline_mode<synchronous>, transform_indices = @transform_1, window_bounds = array<i64: 1, 128>}, {pipeline_mode = #tpu.pipeline_mode<synchronous>, transform_indices = @transform_2, window_bounds = array<i64: 1, 128>}, {transform_indices = @transform_3, window_bounds = array<i64: 4, 128>}, {transform_indices = @transform_4, window_bounds = array<i64: 4, 128>}]} {
    %c0 = arith.constant 0 : index
    %c0_0 = arith.constant 0 : index
    %0 = vector.load %arg1[%c0, %c0_0] : memref<4x1xf32, #tpu.memory_space<vmem>>, vector<4x1xf32>
    %c0_1 = arith.constant 0 : index
    %c0_2 = arith.constant 0 : index
    %1 = vector.load %arg2[%c0_1, %c0_2] : memref<1x128xf32, #tpu.memory_space<vmem>>, vector<1x128xf32>
    %2 = vector.broadcast %0 : vector<4x1xf32> to vector<4x128xf32>
    %3 = vector.broadcast %1 : vector<1x128xf32> to vector<4x128xf32>
    %4 = arith.mulf %2, %3 : vector<4x128xf32>
    %c0_3 = arith.constant 0 : index
    %c0_4 = arith.constant 0 : index
    %5 = vector.load %arg3[%c0_3, %c0_4] : memref<1x128xf32, #tpu.memory_space<vmem>>, vector<1x128xf32>
    %6 = vector.broadcast %5 : vector<1x128xf32> to vector<4x128xf32>
    %7 = arith.addf %4, %6 : vector<4x128xf32>
    %8 = math.sin %7 : vector<4x128xf32>
    %c0_5 = arith.constant 0 : index
    %c0_6 = arith.constant 0 : index
    %9 = vector.load %arg4[%c0_5, %c0_6] : memref<4x128xf32, #tpu.memory_space<vmem>>, vector<4x128xf32>
    %10 = arith.addf %9, %8 : vector<4x128xf32>
    %c0_7 = arith.constant 0 : index
    %c0_8 = arith.constant 0 : index
    %11 = vector.load %arg5[%c0_7, %c0_8] : memref<4x128xf32, #tpu.memory_space<vmem>>, vector<4x128xf32>
    tpu.vector_store %arg5[%c0_7, %c0_8], %10 {strides = array<i32>} : memref<4x128xf32, #tpu.memory_space<vmem>>, vector<4x128xf32>,
    return
  }
  func.func @transform_0(%arg0: i32) -> (i32, i32) {
    %c0_i32 = arith.constant 0 : i32
    %c0_i32_0 = arith.constant 0 : i32
    return %arg0, %c0_i32 : i32, i32
  }
  func.func @transform_1(%arg0: i32) -> (i32, i32) {
    %c0_i32 = arith.constant 0 : i32
    %c0_i32_0 = arith.constant 0 : i32
    %c0_i32_1 = arith.constant 0 : i32
    return %c0_i32, %c0_i32_0 : i32, i32
  }
  func.func @transform_2(%arg0: i32) -> (i32, i32) {
    %c0_i32 = arith.constant 0 : i32
    %c0_i32_0 = arith.constant 0 : i32
    %c0_i32_1 = arith.constant 0 : i32
    return %c0_i32, %c0_i32_0 : i32, i32
  }
  func.func @transform_3(%arg0: i32) -> (i32, i32) {
    %c0_i32 = arith.constant 0 : i32
    %c0_i32_0 = arith.constant 0 : i32
    return %arg0, %c0_i32 : i32, i32
  }
  func.func @transform_4(%arg0: i32) -> (i32, i32) {
    %c0_i32 = arith.constant 0 : i32
    %c0_i32_0 = arith.constant 0 : i32
    return %arg0, %c0_i32 : i32, i32
  }
}

</mosaic_0001>

<bundles_post_ra>
// kernel: tpu_custom_call.1
= control target key start
LH: loop header
LB: loop body
LE: loop exit
PB: predicated region body
PF: predicated region fallthrough
CT: control target
= control target key end

     0   :  { %v206_v1 = vmov 0   ;;  %s275_s0 = inlined_call_operand.vmem [shape: f32[4,1], index: 0, kind: input, shape index: {}]   ;;  %s276_s1 = inlined_call_operand.vmem [shape: f32[1,128], index: 1, kind: input, shape index: {}]   ;;  %s277_s2 = inlined_call_operand.vmem [shape: f32[1,128], index: 2, kind: input, shape index: {}]   ;;  %s278_s3 = inlined_call_operand.vmem [shape: f32[4,128], index: 3, kind: input, shape index: {}]   ;;  %s279_s4 = inlined_call_operand.hbm [shape: f32[4,128], index: 4, kind: output, shape index: {}]  }
   0x1   :  { %v18_v0 = vld [vmem:[%s275_s0] sm:$0xf]  ;;  %179 = vset.pattern.permute.xlu0 %v206_v1 }
   0x2   :  { %22 = vperm.xlu0 %179, %v18_v0  }
   0x3   :  { %9 = vsyncpa [#allocation3], 0  ;;  %v161_v2 = vld [vmem:[%s276_s1] ss:$0 sm:$0xff]  ;;  %v207_v18 = vmov 2102212464  }
   0x4   :  { %v162_v3 = vld [vmem:[%s277_s2] ss:$0 sm:$0xff]  ;;  %v208_v20 = vmov 920167782   ;;  %v209_v24 = vmov 1326507024  }
   0x5   :  { %v210_v26 = vmov 683565275   ;;  %v211_v28 = vmov 2475754826   ;;  %v212_v31 = vmov 2131351028  }
   0x6   :  { %s213_s2 = smov [#allocation2]  }
   0x7   :  { %s153_s21 = sshll.u32 %s213_s2, 4  ;;  %s154_s21 = int_to_ptr.vmem [resolvable:$true] %s153_s21 }
   0x8   :  { %s184_s22 = scalar_lea.vmem %s154_s21, 64  ;;  %p189_p1 = scmp.lt.s32.totalorder %s154_s21, %s154_s21 }
   0x9   :  { %p185_p0 = scmp.ne.s32.totalorder %s154_s21, %s184_s22  ;;  %p190_p2 = scmp.lt.s32.totalorder %s184_s22, %s184_s22 }
   0xb   :  { %p191_p3 = por %p190_p2, %p189_p1 }
   0xd   :  { %p192_p4 = pnand %p191_p3, %p185_p0 }
  0x7d   :  { %v23_v4 = vpop.permute.xlu0 %22 }
  0x7e   :  { %v31_v5 = vmul.f32 %v161_v2, %v23_v4 }
  0x80   :  { %v248_v6 = vadd.f32 %v162_v3, %v31_v5 }
  0x82   :  { %v43_v7 = vand.u32 2139095040, %v248_v6  ;;  %v40_v8 = vand.u32 2147483647, %v248_v6  ;;  %vm42_vm7 = vcmp.lt.s32.totalorder %v248_v6, 0  ;;  %vm132_vm12 = vweird.f32 %v248_v6 }
  0x84   :  { %v44_v9 = vshrl.u32 %v43_v7, 23  ;;  %v47_v11 = vand.u32 8388607, %v40_v8  ;;  %vm41_vm8 = vcmp.le.f32.partialorder %v40_v8, 0.7853982 }
  0x85   :  { %v144_v8 = vld [vmem:[%s278_s3] sm:$0xf] }
  0x86   :  { %v163_v10 = vadd.s32 4294967169, %v44_v9  ;;  %v48_v14 = vor.u32 8388608, %v47_v11 }
  0x88   :  { %v50_v12 = vadd.s32 1, %v163_v10  ;;  %v88_v22 = vshll.u32 %v48_v14, 8 }
  0x8a   :  { %vm51_vm0 = vcmp.gt.s32.totalorder %v50_v12, 0 }
  0x8b   :  { %v52_v13 = vsel %vm51_vm0, %v50_v12, 0 }
  0x8c   :  { %v54_v15 = vand.u32 31, %v52_v13  ;;  %v53_v16 = vshrl.u32 %v52_v13, 5 }
  0x8e   :  { %v55_v17 = vsub.s32 32, %v54_v15  ;;  %v66_v19 = vshll.u32 %v207_v18, %v54_v15  ;;  %v69_v21 = vshll.u32 %v208_v20, %v54_v15  ;;  %v57_v27 = vshll.u32 %v210_v26, %v54_v15 }
  0x8f   :  { %v60_v30 = vshll.u32 %v211_v28, %v54_v15  ;;  %v63_v33 = vshll.u32 %v212_v31, %v54_v15  ;;  %vm75_vm1 = vcmp.lt.s32.totalorder %v53_v16, 4  ;;  %vm72_vm2 = vcmp.lt.s32.totalorder %v53_v16, 1 }
  0x90   :  { %v67_v23 = vshrl.u32 %v208_v20, %v55_v17  ;;  %v70_v25 = vshrl.u32 %v209_v24, %v55_v17  ;;  %v58_v29 = vshrl.u32 %v211_v28, %v55_v17  ;;  %v61_v32 = vshrl.u32 %v212_v31, %v55_v17 }
  0x91   :  { %v64_v34 = vshrl.u32 %v207_v18, %v55_v17  ;;  %v56_v38 = vshrl.u32 %v210_v26, %v55_v17  ;;  %vm73_vm3 = vcmp.lt.s32.totalorder %v53_v16, 2  ;;  %vm74_vm4 = vcmp.lt.s32.totalorder %v53_v16, 3 }
  0x92   :  { %v68_v35 = vor.u32 %v67_v23, %v66_v19  ;;  %v71_v36 = vor.u32 %v70_v25, %v69_v21  ;;  %v59_v37 = vor.u32 %v58_v29, %v57_v27  ;;  %v62_v39 = vor.u32 %v61_v32, %v60_v30 }
  0x93   :  { %v65_v40 = vor.u32 %v64_v34, %v63_v33 }
  0x94   :  { %v81_v41 = vsel %vm75_vm1, %v68_v35, 920167782  ;;  %v85_v42 = vsel %vm75_vm1, %v71_v36, 1326507024  ;;  %v80_v44 = vsel %vm72_vm2, %v59_v37, %v62_v39  ;;  %v76_v47 = vsel %vm72_vm2, %v56_v38, %v59_v37 }
  0x95   :  { %v77_v43 = vsel %vm75_vm1, %v65_v40, 2102212464  ;;  %v82_v45 = vsel %vm74_vm4, %v65_v40, %v81_v41  ;;  %v84_v46 = vsel %vm72_vm2, %v62_v39, %v65_v40  ;;  %v86_v50 = vsel %vm74_vm4, %v68_v35, %v85_v42 }
  0x96   :  { %v78_v48 = vsel %vm74_vm4, %v62_v39, %v77_v43  ;;  %v83_v49 = vsel %vm73_vm3, %v80_v44, %v82_v45  ;;  %v87_v51 = vsel %vm73_vm3, %v84_v46, %v86_v50 }
  0x97   :  { %v254_v52 = vmul.u32.u64.low %v88_v22, %v83_v49  ;;  %v255_v53 = vmul.u32.u64.high %v88_v22, %v83_v49, %v254_v52  ;;  %v257_v54 = vmul.u32.u64.low %v88_v22, %v87_v51  ;;  %v258_v55 = vmul.u32.u64.high %v88_v22, %v87_v51, %v257_v54 }
  0x98   :  { %v79_v56 = vsel %vm73_vm3, %v76_v47, %v78_v48 }
  0x99   :  { %v98_v57 = vadd.s32 1, %v255_v53  ;;  %v95_v58 = vmul.u32 %v88_v22, %v79_v56  ;;  %vm97_vm5 = vc.u32 %v258_v55, %v254_v52  ;;  %v96_v7 = vadd.s32 %v254_v52, %v258_v55 }
  0x9b   :  { %v99_v59 = vsel %vm97_vm5, %v98_v57, %v255_v53 }
  0x9c   :  { %v100_v60 = vadd.s32 %v99_v59, %v95_v58 }
  0x9e   :  { %v101_v61 = vadd.s32 536870912, %v100_v60 }
  0xa0   :  { %v102_v62 = vshrl.u32 %v101_v61, 30 }
  0xa2   :  { %v103_v63 = vshll.u32 %v102_v62, 30  ;;  %v126_v21 = vsub.s32 4, %v102_v62 }
  0xa4   :  { %v104_v0 = vsub.s32 %v100_v60, %v103_v63  ;;  %v127_v24 = vsel %vm42_vm7, %v126_v21, %v102_v62 }
  0xa5   :  { %v129_v25 = vsel %vm41_vm8, 0, %v127_v24 }
  0xa6   :  { %v106_v1 = vsub.s32 0, %v104_v0  ;;  %v133_v26 = vadd.s32 3, %v129_v25 }
  0xa8   :  { %v164_v2 = vmin.u32 %v106_v1, %v104_v0  ;;  %v134_v27 = vand.u32 3, %v133_v26 }
  0xaa   :  { %v108_v3 = vclz %v164_v2  ;;  %vm139_vm9 = vcmp.eq.s32.totalorder %v134_v27, 2  ;;  %vm136_vm10 = vcmp.eq.s32.totalorder %v134_v27, 0  ;;  %vm135_vm11 = vcmp.lt.s32.totalorder %v134_v27, 2 }
  0xac   :  { %v165_v4 = vadd.s32 4294967294, %v108_v3 }
  0xae   :  { %vm166_vm6 = vcmp.lt.s32.totalorder %v165_v4, 0 }
  0xaf   :  { %v111_v5 = vsel %vm166_vm6, 0, %v165_v4 }
  0xb0   :  { %v112_v9 = vsub.s32 32, %v111_v5  ;;  %v116_v10 = vsub.s32 4294967266, %v111_v5  ;;  %v113_v11 = vshll.u32 %v104_v0, %v111_v5 }
  0xb2   :  { %v114_v12 = vshrl.u32 %v96_v7, %v112_v9  ;;  %v117_v13 = vadd.s32 127, %v116_v10 }
  0xb4   :  { %v115_v14 = vor.u32 %v114_v12, %v113_v11  ;;  %v118_v15 = vshll.u32 %v117_v13, 23 }
  0xb6   :  { %v119_v16 = vor.u32 4788187, %v118_v15  ;;  %v122_v18 = vcvt.s32.f32 %v115_v14 }
  0xb8   :  { %v120_v17 = vand.u32 2147483647, %v119_v16 }
  0xba   :  { %v123_v19 = vmul.f32 %v122_v18, %v120_v17 }
  0xbc   :  { %v124_v20 = vxor.u32 2147483648, %v123_v19 }
  0xbe   :  { %v125_v22 = vsel %vm42_vm7, %v124_v20, %v123_v19 }
  0xbf   :  { %v128_v23 = vsel %vm41_vm8, %v248_v6, %v125_v22 }
  0xc0   :  { %180 = vcosq.f32 %v128_v23 }
  0xc1   :  { %182 = vsinq.f32 %v128_v23 }
  0xcd   :  { %v181_v28 = vpop.eup %180 }
  0xce   :  { %v183_v29 = vpop.eup %182  ;;  %v140_v30 = vxor.u32 2147483648, %v181_v28 }
  0xcf   :  { %v137_v31 = vxor.u32 2147483648, %v183_v29 }
  0xd0   :  { %v141_v32 = vsel %vm139_vm9, %v140_v30, %v183_v29 }
  0xd1   :  { %v138_v33 = vsel %vm136_vm10, %v181_v28, %v137_v31 }
  0xd2   :  { %v142_v34 = vsel %vm135_vm11, %v138_v33, %v141_v32 }
  0xd3   :  { %v143_v35 = vsel %vm132_vm12, nan, %v142_v34 }
  0xd4   :  { %v145_v36 = vadd.f32 %v144_v8, %v143_v35 }
  0xd6   :  { %146 = vst [vmem:[#allocation2] sm:$0xf] %v145_v36 }
  0xd7   :  { %195 = shalt.err (!%p192_p4)
}
  0xd8   :  { %156 = dma.vmem_to_hbm [thread:$0]  %s154_s21, 64, %s279_s4, [#allocation3]  }
  0xd9   :  { %204 = dma.done.wait [#allocation3], 64  }
  0xda   :  { %205 = vsyncadd [#allocation3], 4294967232 }
  0xdb   :  { %160 = vsyncpa [#allocation3], 1 }

</bundles_post_ra>
